<compile_context>
chip_gen: v7x
topology: tpu7x:2x2x1
jax: 0.10.0
libtpu: 0.0.40
codegen_flags: <defaults>
</compile_context>

<pallas_src>
import jax
import jax.numpy as jnp
from jax import lax
from jax.experimental import pallas as pl
from jax.experimental.pallas import tpu as pltpu

D_IN = 32                      # input_size
H1, H2, H3, H4 = 256, 128, 64, 1


def _round_up(n, m):
    return ((n + m - 1) // m) * m


def _device_kind():
    try:
        return jax.devices()[0].device_kind.lower()
    except Exception:
        return ""


def default_compute_dtype():
    """bf16 matmul inputs on v5e/v5p/v6e/v7x (all have bf16 MXUs); f32 on v2-v4."""
    kind = _device_kind()
    if "tpu" not in kind:
        return jnp.float32
    for old in ("v2", "v3", "v4"):
        if old in kind:
            return jnp.float32
    return jnp.bfloat16


def _num_tensorcores():
    """TensorCores sharing one pallas_call via the 'parallel' grid axis."""
    kind = _device_kind()
    return 2 if any(t in kind for t in ("v7", "v5p", "v4")) else 1


def mlp_kernel(x_ref,
               w1_ref, b1_ref,
               w2_ref, b2_ref,
               w3_ref, b3_ref,
               w4_ref, b4_ref,
               o_ref):
    """Full 4-layer MLP hot path (matmuls + bias + ReLU) on one batch tile."""
    wdt = w1_ref.dtype  # matmul-input dtype (bf16 on v5e+/v6e/v7x, f32 on v2-v4)

    # In-kernel cast of x (f32 -> MXU dtype): VPU work hidden under the matmuls,
    # avoids a separate wrapper-side HBM pass over x.
    h = jnp.dot(x_ref[...].astype(wdt), w1_ref[...],
                preferred_element_type=jnp.float32)
    h = jnp.maximum(h + b1_ref[...], 0.0)

    h = jnp.dot(h.astype(wdt), w2_ref[...], preferred_element_type=jnp.float32)
    h = jnp.maximum(h + b2_ref[...], 0.0)

    h = jnp.dot(h.astype(wdt), w3_ref[...], preferred_element_type=jnp.float32)
    h = jnp.maximum(h + b3_ref[...], 0.0)

    # Final layer has N=1: compute it transposed as a (1, tb) tile so the output
    # store is lane-dense (tb is a multiple of 128 -> unmasked vst).
    out = lax.dot_general(
        w4_ref[...], h.astype(wdt),                    # (64, 1) x (tb, 64)
        dimension_numbers=(((0,), (1,)), ((), ())),    # -> (1, tb)
        preferred_element_type=jnp.float32)
    out = out + b4_ref[...]                            # b4 is (1, 1), broadcasts
    o_ref[...] = out.astype(o_ref.dtype)


def deep_dnn_forward(x, params, *, tb=2048, compute_dtype=None):
    """x: (B, D_IN) float32. Returns (B, 1) float32."""
    (w1, b1), (w2, b2), (w3, b3), (w4, b4) = params
    B, D = x.shape
    assert D == w1.shape[0]

    cd = default_compute_dtype() if compute_dtype is None else compute_dtype
    num_tc = _num_tensorcores()

    # Effective batch tile: 128-aligned, no larger than needed for small B.
    tb_eff = min(tb, max(128, _round_up(B, 128)))
    # On multi-TensorCore chips keep >= num_tc grid steps so the "parallel"
    # batch axis actually shards across cores.
    if num_tc > 1 and B > 128:
        per_core = _round_up((B + num_tc - 1) // num_tc, 128)
        tb_eff = min(tb_eff, max(128, per_core))
    tb_eff = _round_up(tb_eff, 128)
    B_pad = _round_up(B, tb_eff)

    if B_pad != B:
        x = jnp.pad(x, ((0, B_pad - B), (0, 0)))

    # Weights cast to the MXU dtype in the wrapper (tiny, one-time); biases stay
    # f32 and are added to the f32 accumulator inside the kernel.  x stays f32
    # and is cast inside the kernel.
    w1c, w2c, w3c, w4c = (w.astype(cd) for w in (w1, w2, w3, w4))

    # Weights/biases total ~200 KB -> keep each as a single full-array block
    # resident in VMEM across all batch tiles; grid only over the batch.
    def full(shape):
        return pl.BlockSpec(shape, lambda i: (0,) * len(shape))

    w_itemsize = jnp.dtype(cd).itemsize
    n_wparams = D * H1 + H1 * H2 + H2 * H3 + H3 * H4
    cost = pl.CostEstimate(
        flops=2 * B_pad * n_wparams,
        transcendentals=0,
        bytes_accessed=(B_pad * D * 4                   # x (f32 in HBM)
                        + n_wparams * w_itemsize         # weights
                        + (H1 + H2 + H3 + H4) * 4        # biases
                        + B_pad * H4 * 4))               # output

    out_t = pl.pallas_call(
        mlp_kernel,
        out_shape=jax.ShapeDtypeStruct((1, B_pad), jnp.float32),
        grid_spec=pltpu.PrefetchScalarGridSpec(
            num_scalar_prefetch=0,
            grid=(B_pad // tb_eff,),
            in_specs=[
                pl.BlockSpec((tb_eff, D), lambda i: (i, 0)),   # x tile (f32)
                full(w1c.shape), full(b1.shape),
                full(w2c.shape), full(b2.shape),
                full(w3c.shape), full(b3.shape),
                full(w4c.shape), full(b4.shape),
            ],
            # lane-dense output: one (1, tb) block per batch tile
            out_specs=pl.BlockSpec((1, tb_eff), lambda i: (0, i)),
        ),
        compiler_params=pltpu.CompilerParams(
            dimension_semantics=("parallel",)),
        cost_estimate=cost,
    )(x, w1c, b1, w2c, b2, w3c, b3, w4c, b4)

    # (1, B_pad) -> (B, 1); strip batch padding in the wrapper (cheap XLA ops).
    return out_t.reshape(B_pad, 1)[:B]


def init_params(key, input_size):
    """Deterministic init matching PyTorch Linear shapes (stored transposed)."""
    dims = [(input_size, H1), (H1, H2), (H2, H3), (H3, H4)]
    params = []
    for li, (din, dout) in enumerate(dims):
        kw, kb = jax.random.split(jax.random.fold_in(key, li))
        bound = 1.0 / jnp.sqrt(din)
        w = jax.random.uniform(kw, (din, dout), jnp.float32, -bound, bound)
        # biases as (1, dout) 2-D rows for clean TPU layout / broadcasting
        b = jax.random.uniform(kb, (1, dout), jnp.float32, -bound, bound)
        params.append((w, b))
    return params


def reference_forward(x, params, compute_dtype=jnp.float32):
    """Same math as the kernel (matmul inputs in compute_dtype, f32 accumulation)."""
    cd = compute_dtype
    h = x.astype(cd)
    for i, (w, b) in enumerate(params):
        h = jnp.dot(h, w.astype(cd), preferred_element_type=jnp.float32) + b
        if i < len(params) - 1:
            h = jnp.maximum(h, 0.0).astype(cd)
    return h


if __name__ == "__main__":
    key = jax.random.PRNGKey(0)
    kx, kp = jax.random.split(key)

    params = init_params(kp, D_IN)
    cd = default_compute_dtype()
    tol = 1e-5 if jnp.dtype(cd) == jnp.dtype(jnp.float32) else 1e-3

    # (B, tb): B=16 exercises the small-batch path (tile clamped to 128);
    # B=300 with tb=128 exercises padding (-> 384) and a multi-step grid.
    for B, tb in ((16, 2048), (300, 128)):
        x = jax.random.normal(jax.random.fold_in(kx, B), (B, D_IN), jnp.float32)
        out = jax.block_until_ready(
            deep_dnn_forward(x, params, tb=tb, compute_dtype=cd))
        ref = reference_forward(x, params, compute_dtype=cd)
        assert out.shape == (B, 1), out.shape
        assert jnp.allclose(out, ref, atol=tol, rtol=tol), \
            f"B={B} max abs err {jnp.max(jnp.abs(out - ref))}"

    print("KERNEL_OK")
</pallas_src>

<mosaic_0001>
module attributes {stable_mosaic.version = 11 : i64} {
  func.func @mlp_kernel(%arg0: i32, %arg1: memref<128x32xf32, #tpu.memory_space<vmem>>, %arg2: memref<32x256xf32, #tpu.memory_space<vmem>>, %arg3: memref<1x256xf32, #tpu.memory_space<vmem>>, %arg4: memref<256x128xf32, #tpu.memory_space<vmem>>, %arg5: memref<1x128xf32, #tpu.memory_space<vmem>>, %arg6: memref<128x64xf32, #tpu.memory_space<vmem>>, %arg7: memref<1x64xf32, #tpu.memory_space<vmem>>, %arg8: memref<64x1xf32, #tpu.memory_space<vmem>>, %arg9: memref<1x1xf32, #tpu.memory_space<vmem>>, %arg10: memref<1x128xf32, #tpu.memory_space<vmem>>) attributes {dimension_semantics = [#tpu.dimension_semantics<parallel>], iteration_bounds = array<i64: 1>, scalar_prefetch = 0 : i64, scratch_operands = 0 : i64, tpu.core_type = #tpu.core_type<tc>, window_params = [{transform_indices = @transform_0, window_bounds = array<i64: 128, 32>}, {pipeline_mode = #tpu.pipeline_mode<synchronous>, transform_indices = @transform_1, window_bounds = array<i64: 32, 256>}, {pipeline_mode = #tpu.pipeline_mode<synchronous>, transform_indices = @transform_2, window_bounds = array<i64: 1, 256>}, {pipeline_mode = #tpu.pipeline_mode<synchronous>, transform_indices = @transform_3, window_bounds = array<i64: 256, 128>}, {pipeline_mode = #tpu.pipeline_mode<synchronous>, transform_indices = @transform_4, window_bounds = array<i64: 1, 128>}, {pipeline_mode = #tpu.pipeline_mode<synchronous>, transform_indices = @transform_5, window_bounds = array<i64: 128, 64>}, {pipeline_mode = #tpu.pipeline_mode<synchronous>, transform_indices = @transform_6, window_bounds = array<i64: 1, 64>}, {pipeline_mode = #tpu.pipeline_mode<synchronous>, transform_indices = @transform_7, window_bounds = array<i64: 64, 1>}, {pipeline_mode = #tpu.pipeline_mode<synchronous>, transform_indices = @transform_8, window_bounds = array<i64: 1, 1>}, {transform_indices = @transform_9, window_bounds = array<i64: 1, 128>}]} {
    %c0 = arith.constant 0 : index
    %c0_0 = arith.constant 0 : index
    %0 = vector.load %arg1[%c0, %c0_0] : memref<128x32xf32, #tpu.memory_space<vmem>>, vector<128x32xf32>
    %c0_1 = arith.constant 0 : index
    %c0_2 = arith.constant 0 : index
    %1 = vector.load %arg2[%c0_1, %c0_2] : memref<32x256xf32, #tpu.memory_space<vmem>>, vector<32x256xf32>
    %cst = arith.constant dense<0.000000e+00> : vector<128x256xf32>
    %2 = tpu.matmul %0, %1, %cst {dimension_numbers = #tpu.dot_dimension_numbers<[1], [0], [0], [1], [0, 0, 1, 1], [], []>} : vector<128x32xf32>, vector<32x256xf32>, vector<128x256xf32> -> vector<128x256xf32>
    %c0_3 = arith.constant 0 : index
    %c0_4 = arith.constant 0 : index
    %3 = vector.load %arg3[%c0_3, %c0_4] : memref<1x256xf32, #tpu.memory_space<vmem>>, vector<1x256xf32>
    %4 = vector.broadcast %3 : vector<1x256xf32> to vector<128x256xf32>
    %5 = arith.addf %2, %4 : vector<128x256xf32>
    %cst_5 = arith.constant 0.000000e+00 : f32
    %6 = vector.broadcast %cst_5 : f32 to vector<128x256xf32>
    %7 = arith.maximumf %5, %6 : vector<128x256xf32>
    %c0_6 = arith.constant 0 : index
    %c0_7 = arith.constant 0 : index
    %8 = vector.load %arg4[%c0_6, %c0_7] : memref<256x128xf32, #tpu.memory_space<vmem>>, vector<256x128xf32>
    %cst_8 = arith.constant dense<0.000000e+00> : vector<128x128xf32>
    %9 = tpu.matmul %7, %8, %cst_8 {dimension_numbers = #tpu.dot_dimension_numbers<[1], [0], [0], [1], [0, 0, 1, 1], [], []>} : vector<128x256xf32>, vector<256x128xf32>, vector<128x128xf32> -> vector<128x128xf32>
    %c0_9 = arith.constant 0 : index
    %c0_10 = arith.constant 0 : index
    %10 = vector.load %arg5[%c0_9, %c0_10] : memref<1x128xf32, #tpu.memory_space<vmem>>, vector<1x128xf32>
    %11 = vector.broadcast %10 : vector<1x128xf32> to vector<128x128xf32>
    %12 = arith.addf %9, %11 : vector<128x128xf32>
    %cst_11 = arith.constant 0.000000e+00 : f32
    %13 = vector.broadcast %cst_11 : f32 to vector<128x128xf32>
    %14 = arith.maximumf %12, %13 : vector<128x128xf32>
    %c0_12 = arith.constant 0 : index
    %c0_13 = arith.constant 0 : index
    %15 = vector.load %arg6[%c0_12, %c0_13] : memref<128x64xf32, #tpu.memory_space<vmem>>, vector<128x64xf32>
    %cst_14 = arith.constant dense<0.000000e+00> : vector<128x64xf32>
    %16 = tpu.matmul %14, %15, %cst_14 {dimension_numbers = #tpu.dot_dimension_numbers<[1], [0], [0], [1], [0, 0, 1, 1], [], []>} : vector<128x128xf32>, vector<128x64xf32>, vector<128x64xf32> -> vector<128x64xf32>
    %c0_15 = arith.constant 0 : index
    %c0_16 = arith.constant 0 : index
    %17 = vector.load %arg7[%c0_15, %c0_16] : memref<1x64xf32, #tpu.memory_space<vmem>>, vector<1x64xf32>
    %18 = vector.broadcast %17 : vector<1x64xf32> to vector<128x64xf32>
    %19 = arith.addf %16, %18 : vector<128x64xf32>
    %cst_17 = arith.constant 0.000000e+00 : f32
    %20 = vector.broadcast %cst_17 : f32 to vector<128x64xf32>
    %21 = arith.maximumf %19, %20 : vector<128x64xf32>
    %c0_18 = arith.constant 0 : index
    %c0_19 = arith.constant 0 : index
    %22 = vector.load %arg8[%c0_18, %c0_19] : memref<64x1xf32, #tpu.memory_space<vmem>>, vector<64x1xf32>
    %cst_20 = arith.constant dense<0.000000e+00> : vector<1x128xf32>
    %23 = tpu.matmul %22, %21, %cst_20 {dimension_numbers = #tpu.dot_dimension_numbers<[0], [1], [1], [0], [0, 1, 1, 0], [], []>} : vector<64x1xf32>, vector<128x64xf32>, vector<1x128xf32> -> vector<1x128xf32>
    %c0_21 = arith.constant 0 : index
    %c0_22 = arith.constant 0 : index
    %24 = vector.load %arg9[%c0_21, %c0_22] : memref<1x1xf32, #tpu.memory_space<vmem>>, vector<1x1xf32>
    %25 = vector.broadcast %24 : vector<1x1xf32> to vector<1x128xf32>
    %26 = arith.addf %23, %25 : vector<1x128xf32>
    %c0_23 = arith.constant 0 : index
    %c0_24 = arith.constant 0 : index
    %27 = vector.load %arg10[%c0_23, %c0_24] : memref<1x128xf32, #tpu.memory_space<vmem>>, vector<1x128xf32>
    tpu.vector_store %arg10[%c0_23, %c0_24], %26 {strides = array<i32>} : memref<1x128xf32, #tpu.memory_space<vmem>>, vector<1x128xf32>,
    return
  }
  func.func @transform_0(%arg0: i32) -> (i32, i32) {
    %c0_i32 = arith.constant 0 : i32
    %c0_i32_0 = arith.constant 0 : i32
    return %arg0, %c0_i32 : i32, i32
  }
  func.func @transform_1(%arg0: i32) -> (i32, i32) {
    %c0_i32 = arith.constant 0 : i32
    %c0_i32_0 = arith.constant 0 : i32
    %c0_i32_1 = arith.constant 0 : i32
    return %c0_i32, %c0_i32_0 : i32, i32
  }
  func.func @transform_2(%arg0: i32) -> (i32, i32) {
    %c0_i32 = arith.constant 0 : i32
    %c0_i32_0 = arith.constant 0 : i32
    %c0_i32_1 = arith.constant 0 : i32
    return %c0_i32, %c0_i32_0 : i32, i32
  }
  func.func @transform_3(%arg0: i32) -> (i32, i32) {
    %c0_i32 = arith.constant 0 : i32
    %c0_i32_0 = arith.constant 0 : i32
    %c0_i32_1 = arith.constant 0 : i32
    return %c0_i32, %c0_i32_0 : i32, i32
  }
  func.func @transform_4(%arg0: i32) -> (i32, i32) {
    %c0_i32 = arith.constant 0 : i32
    %c0_i32_0 = arith.constant 0 : i32
    %c0_i32_1 = arith.constant 0 : i32
    return %c0_i32, %c0_i32_0 : i32, i32
  }
  func.func @transform_5(%arg0: i32) -> (i32, i32) {
    %c0_i32 = arith.constant 0 : i32
    %c0_i32_0 = arith.constant 0 : i32
    %c0_i32_1 = arith.constant 0 : i32
    return %c0_i32, %c0_i32_0 : i32, i32
  }
  func.func @transform_6(%arg0: i32) -> (i32, i32) {
    %c0_i32 = arith.constant 0 : i32
    %c0_i32_0 = arith.constant 0 : i32
    %c0_i32_1 = arith.constant 0 : i32
    return %c0_i32, %c0_i32_0 : i32, i32
  }
  func.func @transform_7(%arg0: i32) -> (i32, i32) {
    %c0_i32 = arith.constant 0 : i32
    %c0_i32_0 = arith.constant 0 : i32
    %c0_i32_1 = arith.constant 0 : i32
    return %c0_i32, %c0_i32_0 : i32, i32
  }
  func.func @transform_8(%arg0: i32) -> (i32, i32) {
    %c0_i32 = arith.constant 0 : i32
    %c0_i32_0 = arith.constant 0 : i32
    %c0_i32_1 = arith.constant 0 : i32
    return %c0_i32, %c0_i32_0 : i32, i32
  }
  func.func @transform_9(%arg0: i32) -> (i32, i32) {
    %c0_i32 = arith.constant 0 : i32
    %c0_i32_0 = arith.constant 0 : i32
    return %c0_i32, %arg0 : i32, i32
  }
}

</mosaic_0001>

<bundles_post_ra>
// kernel: tpu_custom_call.1
= control target key start
LH: loop header
LB: loop body
LE: loop exit
PB: predicated region body
PF: predicated region fallthrough
CT: control target
= control target key end

     0   :  { %s1737_s0 = inlined_call_operand.vmem [shape: f32[128,32], index: 0, kind: input, shape index: {}]   ;;  %s1738_s1 = inlined_call_operand.vmem [shape: f32[32,256], index: 1, kind: input, shape index: {}]   ;;  %s1739_s2 = inlined_call_operand.vmem [shape: f32[1,256], index: 2, kind: input, shape index: {}]   ;;  %s1740_s3 = inlined_call_operand.vmem [shape: f32[256,128], index: 3, kind: input, shape index: {}]   ;;  %s1741_s4 = inlined_call_operand.vmem [shape: f32[1,128], index: 4, kind: input, shape index: {}]   ;;  %s1742_s5 = inlined_call_operand.vmem [shape: f32[128,64], index: 5, kind: input, shape index: {}]   ;;  %s1743_s6 = inlined_call_operand.vmem [shape: f32[1,64], index: 6, kind: input, shape index: {}]   ;;  %s1744_s7 = inlined_call_operand.vmem [shape: f32[64,1], index: 7, kind: input, shape index: {}]   ;;  %s1745_s8 = inlined_call_operand.<no memory space> [shape: f32[1,1], index: 8, kind: input, shape index: {}]   ;;  %s1746_s9 = inlined_call_operand.hbm [shape: f32[1,128], index: 9, kind: output, shape index: {}]  }
   0x1   :  { %v14_v0 = vstv %s1745_s8 }
   0x2   :  { %15 = vst [vmem:[#allocation2] sm:$0x1] %v14_v0 }
   0x3   :  { %v52_v1 = vld [vmem:[%s1738_s1 + $0x8] sm:$0xff]  ;;  %v54_v2 = vld [vmem:[%s1738_s1 + $0x18] sm:$0xff]  ;;  %v51_v3 = vld [vmem:[%s1738_s1] sm:$0xff]  ;;  %v1274_v8 = vmov 0.0   ;;  %vm71_vm0 = vcmask 261120  }
   0x4   :  { %v1139_v4 = vpack.c.bf16 %v54_v2, %v52_v1  ;;  %v53_v5 = vld [vmem:[%s1738_s1 + $0x10] sm:$0xff]  ;;  %v56_v6 = vld [vmem:[%s1738_s1 + $0x28] sm:$0xff]  ;;  %v58_v7 = vld [vmem:[%s1738_s1 + $0x38] sm:$0xff]  ;;  %184 = vmatprep.mubr.f32.mxu0 %v1274_v8 }
   0x5   :  { %v1141_v9 = vpack.c.bf16 %v53_v5, %v51_v3  ;;  %v1143_v10 = vpack.c.bf16 %v58_v7, %v56_v6  ;;  %v55_v11 = vld [vmem:[%s1738_s1 + $0x20] sm:$0xff]  ;;  %v57_v12 = vld [vmem:[%s1738_s1 + $0x30] sm:$0xff]  ;;  %v330_v16 = vld [vmem:[%s1740_s3 + $0x88] sm:$0xff] }
   0x6   :  { %1140 = vmatprep.subr.bf16.mxu0 %v1139_v4  ;;  %v1145_v13 = vpack.c.bf16 %v57_v12, %v55_v11  ;;  %v35_v14 = vld [vmem:[%s1737_s0] sm:$0xff]  ;;  %v314_v19 = vld [vmem:[%s1740_s3 + $0x8] sm:$0xff]  ;;  %v331_v20 = vld [vmem:[%s1740_s3 + $0x90] sm:$0xff] }
   0x7   :  { %1142 = vmatpush1.bf16.msra.mxu0 %v1141_v9  ;;  %v329_v15 = vld [vmem:[%s1740_s3 + $0x80] sm:$0xff]  ;;  %v332_v21 = vld [vmem:[%s1740_s3 + $0x98] sm:$0xff]  ;;  %v315_v24 = vld [vmem:[%s1740_s3 + $0x10] sm:$0xff] }
   0x8   :  { %1144 = vmatprep.subr.bf16.mxu0 %v1143_v10  ;;  %v313_v17 = vld [vmem:[%s1740_s3] sm:$0xff]  ;;  %v1147_v18 = vpack.c.bf16 %v330_v16, %v329_v15  ;;  %v1151_v23 = vpack.c.bf16 %v332_v21, %v331_v20  ;;  %v316_v25 = vld [vmem:[%s1740_s3 + $0x18] sm:$0xff]  ;;  %v334_v27 = vld [vmem:[%s1740_s3 + $0xa8] sm:$0xff] }
   0x9   :  { %v1149_v22 = vpack.c.bf16 %v314_v19, %v313_v17  ;;  %v333_v26 = vld [vmem:[%s1740_s3 + $0xa0] sm:$0xff]  ;;  %v36_v28 = vld [vmem:[%s1737_s0 + $0x8] sm:$0xff]  ;;  %v1153_v29 = vpack.c.bf16 %v316_v25, %v315_v24  ;;  %v335_v33 = vld [vmem:[%s1740_s3 + $0xb0] sm:$0xff] }
   0xa   :  { %1148 = vmatprep.subr.bf16.mxu1 %v1147_v18  ;;  %v1155_v30 = vpack.c.bf16 %v334_v27, %v333_v26  ;;  %v317_v31 = vld [vmem:[%s1740_s3 + $0x20] sm:$0xff]  ;;  %v318_v32 = vld [vmem:[%s1740_s3 + $0x28] sm:$0xff]  ;;  %v336_v34 = vld [vmem:[%s1740_s3 + $0xb8] sm:$0xff] }
   0xb   :  { %1146 = vmatpush1.bf16.msra.mxu0 %v1145_v13  ;;  %1150 = vmatpush3.bf16.msra.mxu1 %v1149_v22  ;;  %v37_v35 = vld [vmem:[%s1737_s0 + $0x10] sm:$0xff]  ;;  %v1157_v36 = vpack.c.bf16 %v318_v32, %v317_v31  ;;  %v1159_v37 = vpack.c.bf16 %v336_v34, %v335_v33  ;;  %v320_v39 = vld [vmem:[%s1740_s3 + $0x38] sm:$0xff] }
   0xc   :  { %1152 = vmatprep.subr.bf16.mxu1 %v1151_v23  ;;  %v319_v38 = vld [vmem:[%s1740_s3 + $0x30] sm:$0xff] }
   0xe   :  { %884 = vmatmul.mubr.msk.f32.vlgmr.msra.gmra.mrb[0].mxu0 %vm71_vm0, %v35_v14 }
   0xf   :  { %190 = vmatprep.mubr.f32.mxu0 %v1274_v8  ;;  %1154 = vmatpush3.bf16.msra.mxu1 %v1153_v29 }
  0x10   :  { %1156 = vmatprep.subr.bf16.mxu1 %v1155_v30 }
  0x12   :  { %885 = vmatmul.mubr.msk.f32.gmra.mrb[2].mxu0 %vm71_vm0, %v36_v28 }
  0x13   :  { %196 = vmatprep.mubr.f32.mxu0 %v1274_v8 }
  0x14   :  { %16 = vsyncpa [#allocation4], 0  ;;  %v337_v40 = vld [vmem:[%s1740_s3 + $0xc0] sm:$0xff]  ;;  %v338_v41 = vld [vmem:[%s1740_s3 + $0xc8] sm:$0xff]  ;;  %1158 = vmatpush3.bf16.msra.mxu1 %v1157_v36  ;;  %v1161_v43 = vpack.c.bf16 %v320_v39, %v319_v38  ;;  %v61_v36 = vlaneseq  ;;  %vm1276_vm1 = vmmov 0   ;;  %vm747_vm2 = vcmask 523264  }
  0x15   :  { %v38_v42 = vld [vmem:[%s1737_s0 + $0x18] sm:$0xff]  ;;  %1160 = vmatprep.subr.bf16.mxu1 %v1159_v37  ;;  %v1163_v44 = vpack.c.bf16 %v338_v41, %v337_v40  ;;  %v321_v45 = vld [vmem:[%s1740_s3 + $0x40] sm:$0xff]  ;;  %v322_v46 = vld [vmem:[%s1740_s3 + $0x48] sm:$0xff] }
  0x16   :  { %886 = vmatmul.mubr.msk.f32.gmra.mrb[4].mxu0 %vm71_vm0, %v37_v35  ;;  %v339_v47 = vld [vmem:[%s1740_s3 + $0xd0] sm:$0xff]  ;;  %v340_v48 = vld [vmem:[%s1740_s3 + $0xd8] sm:$0xff]  ;;  %v39_v49 = vld [vmem:[%s1737_s0 + $0x20] sm:$0xff]  ;;  %v1165_v50 = vpack.c.bf16 %v322_v46, %v321_v45  ;;  %v1574_v37 = vshrl.u32 %v61_v36, 7 }
  0x17   :  { %202 = vmatprep.mubr.f32.mxu0 %v1274_v8  ;;  %v1167_v51 = vpack.c.bf16 %v340_v48, %v339_v47  ;;  %v323_v52 = vld [vmem:[%s1740_s3 + $0x50] sm:$0xff]  ;;  %v324_v53 = vld [vmem:[%s1740_s3 + $0x58] sm:$0xff]  ;;  %v341_v54 = vld [vmem:[%s1740_s3 + $0xe0] sm:$0xff] }
  0x18   :  { %1162 = vmatpush3.bf16.msra.mxu1 %v1161_v43  ;;  %v342_v55 = vld [vmem:[%s1740_s3 + $0xe8] sm:$0xff]  ;;  %v1169_v57 = vpack.c.bf16 %v324_v53, %v323_v52  ;;  %v41_v59 = vld [vmem:[%s1737_s0 + $0x30] sm:$0xff]  ;;  %v42_v60 = vld [vmem:[%s1737_s0 + $0x38] sm:$0xff]  ;;  %v63_v38 = vsub.s32 0, %v1574_v37  ;;  %v67_v40 = vsub.s32 1, %v1574_v37 }
  0x19   :  { %1164 = vmatprep.subr.bf16.mxu1 %v1163_v44  ;;  %v40_v56 = vld [vmem:[%s1737_s0 + $0x28] sm:$0xff]  ;;  %v1171_v58 = vpack.c.bf16 %v342_v55, %v341_v54  ;;  %v43_v61 = vld [vmem:[%s1737_s0 + $0x40] sm:$0xff]  ;;  %v45_v63 = vld [vmem:[%s1737_s0 + $0x50] sm:$0xff] }
  0x1a   :  { %887 = vmatmul.mubr.msk.f32.gmra.mrb[6].mxu0 %vm71_vm0, %v38_v42  ;;  %v44_v62 = vld [vmem:[%s1737_s0 + $0x48] sm:$0xff]  ;;  %v46_v0 = vld [vmem:[%s1737_s0 + $0x58] sm:$0xff]  ;;  %v47_v1 = vld [vmem:[%s1737_s0 + $0x60] sm:$0xff] }
  0x1b   :  { %208 = vmatprep.mubr.f32.mxu0 %v1274_v8  ;;  %v48_v2 = vld [vmem:[%s1737_s0 + $0x68] sm:$0xff]  ;;  %v49_v3 = vld [vmem:[%s1737_s0 + $0x70] sm:$0xff]  ;;  %v50_v4 = vld [vmem:[%s1737_s0 + $0x78] sm:$0xff] }
  0x1c   :  { %1166 = vmatpush3.bf16.msra.mxu1 %v1165_v50  ;;  %v325_v5 = vld [vmem:[%s1740_s3 + $0x60] sm:$0xff]  ;;  %v326_v6 = vld [vmem:[%s1740_s3 + $0x68] sm:$0xff]  ;;  %v343_v9 = vld [vmem:[%s1740_s3 + $0xf0] sm:$0xff] }
  0x1d   :  { %1168 = vmatprep.subr.bf16.mxu1 %v1167_v51  ;;  %v1173_v7 = vpack.c.bf16 %v326_v6, %v325_v5  ;;  %v344_v10 = vld [vmem:[%s1740_s3 + $0xf8] sm:$0xff]  ;;  %v327_v12 = vld [vmem:[%s1740_s3 + $0x70] sm:$0xff]  ;;  %v513_v15 = vld [vmem:[%s1742_s5] sm:$0xff] }
  0x1e   :  { %888 = vmatmul.mubr.msk.f32.gmra.mrb[8].mxu0 %vm71_vm0, %v39_v49  ;;  %v1175_v11 = vpack.c.bf16 %v344_v10, %v343_v9  ;;  %v328_v13 = vld [vmem:[%s1740_s3 + $0x78] sm:$0xff]  ;;  %v514_v16 = vld [vmem:[%s1742_s5 + $0x8] sm:$0xff]  ;;  %v515_v17 = vld [vmem:[%s1742_s5 + $0x10] sm:$0xff] }
  0x1f   :  { %214 = vmatprep.mubr.f32.mxu0 %v1274_v8  ;;  %v1177_v14 = vpack.c.bf16 %v328_v13, %v327_v12  ;;  %v1179_v18 = vpack.c.bf16 %v514_v16, %v513_v15  ;;  %v516_v19 = vld [vmem:[%s1742_s5 + $0x18] sm:$0xff]  ;;  %v517_v21 = vld [vmem:[%s1742_s5 + $0x20] sm:$0xff]  ;;  %v518_v22 = vld [vmem:[%s1742_s5 + $0x28] sm:$0xff] }
  0x20   :  { %1170 = vmatpush3.bf16.msra.mxu1 %v1169_v57  ;;  %v1183_v20 = vpack.c.bf16 %v516_v19, %v515_v17  ;;  %v1187_v23 = vpack.c.bf16 %v518_v22, %v517_v21  ;;  %v519_v24 = vld [vmem:[%s1742_s5 + $0x30] sm:$0xff]  ;;  %v520_v25 = vld [vmem:[%s1742_s5 + $0x38] sm:$0xff]  ;;  %v521_v27 = vld [vmem:[%s1742_s5 + $0x40] sm:$0xff] }
  0x21   :  { %1172 = vmatprep.subr.bf16.mxu1 %v1171_v58  ;;  %1180 = vmatprep.subr.bf16.mxu0 %v1179_v18  ;;  %v1191_v26 = vpack.c.bf16 %v520_v25, %v519_v24  ;;  %v522_v28 = vld [vmem:[%s1742_s5 + $0x48] sm:$0xff]  ;;  %v523_v30 = vld [vmem:[%s1742_s5 + $0x50] sm:$0xff]  ;;  %v524_v31 = vld [vmem:[%s1742_s5 + $0x58] sm:$0xff] }
  0x22   :  { %889 = vmatmul.mubr.msk.f32.gmra.mrb[10].mxu0 %vm71_vm0, %v40_v56  ;;  %v1195_v29 = vpack.c.bf16 %v522_v28, %v521_v27  ;;  %v1199_v32 = vpack.c.bf16 %v524_v31, %v523_v30  ;;  %v525_v33 = vld [vmem:[%s1742_s5 + $0x60] sm:$0xff]  ;;  %v526_v34 = vld [vmem:[%s1742_s5 + $0x68] sm:$0xff]  ;;  %vm1681_vm3 = vmpackc.low %vm747_vm2, %vm747_vm2 }
  0x23   :  { %220 = vmatprep.mubr.f32.mxu0 %v1274_v8  ;;  %1182 = vmatpush3.bf16.msra.mxu0 %v1179_v18  ;;  %v1203_v35 = vpack.c.bf16 %v526_v34, %v525_v33  ;;  %v59_v39 = vld [vmem:[%s1739_s2] sm:$0x3] }
  0x24   :  { %1174 = vmatpush3.bf16.msra.mxu1 %v1173_v7  ;;  %1184 = vmatprep.subr.bf16.mxu0 %v1183_v20  ;;  %v1583_v41 = vrot.slane %v59_v39, %v63_v38  ;;  %v1585_v42 = vrot.slane %v59_v39, %v67_v40 }
  0x25   :  { %1176 = vmatprep.subr.bf16.mxu1 %v1175_v11 }
  0x26   :  { %890 = vmatmul.mubr.msk.f32.gmra.mrb[12].mxu0 %vm71_vm0, %v41_v59 }
  0x27   :  { %226 = vmatprep.mubr.f32.mxu0 %v1274_v8  ;;  %1186 = vmatpush3.bf16.msra.mxu0 %v1183_v20 }
  0x28   :  { %1178 = vmatpush3.bf16.msra.mxu1 %v1177_v14  ;;  %1188 = vmatprep.subr.bf16.mxu0 %v1187_v23 }
  0x2a   :  { %891 = vmatmul.mubr.msk.f32.gmra.mrb[14].mxu0 %vm71_vm0, %v42_v60 }
  0x2b   :  { %232 = vmatprep.mubr.f32.mxu0 %v1274_v8  ;;  %1190 = vmatpush3.bf16.msra.mxu0 %v1187_v23 }
  0x2c   :  { %1192 = vmatprep.subr.bf16.mxu0 %v1191_v26 }
  0x2e   :  { %892 = vmatmul.mubr.msk.f32.gmra.mrb[16].mxu0 %vm71_vm0, %v43_v61 }
  0x2f   :  { %238 = vmatprep.mubr.f32.mxu0 %v1274_v8  ;;  %1194 = vmatpush3.bf16.msra.mxu0 %v1191_v26 }
  0x30   :  { %1196 = vmatprep.subr.bf16.mxu0 %v1195_v29 }
  0x32   :  { %893 = vmatmul.mubr.msk.f32.gmra.mrb[18].mxu0 %vm71_vm0, %v44_v62 }
  0x33   :  { %244 = vmatprep.mubr.f32.mxu0 %v1274_v8  ;;  %1198 = vmatpush3.bf16.msra.mxu0 %v1195_v29 }
  0x34   :  { %1200 = vmatprep.subr.bf16.mxu0 %v1199_v32 }
  0x36   :  { %894 = vmatmul.mubr.msk.f32.gmra.mrb[20].mxu0 %vm71_vm0, %v45_v63 }
  0x37   :  { %250 = vmatprep.mubr.f32.mxu0 %v1274_v8  ;;  %1202 = vmatpush3.bf16.msra.mxu0 %v1199_v32 }
  0x38   :  { %1204 = vmatprep.subr.bf16.mxu0 %v1203_v35 }
  0x3a   :  { %895 = vmatmul.mubr.msk.f32.gmra.mrb[22].mxu0 %vm71_vm0, %v46_v0 }
  0x3b   :  { %256 = vmatprep.mubr.f32.mxu0 %v1274_v8  ;;  %1206 = vmatpush3.bf16.msra.mxu0 %v1203_v35 }
  0x3e   :  { %896 = vmatmul.mubr.msk.f32.gmra.mrb[24].mxu0 %vm71_vm0, %v47_v1 }
  0x3f   :  { %262 = vmatprep.mubr.f32.mxu0 %v1274_v8 }
  0x42   :  { %897 = vmatmul.mubr.msk.f32.gmra.mrb[26].mxu0 %vm71_vm0, %v48_v2 }
  0x43   :  { %268 = vmatprep.mubr.f32.mxu0 %v1274_v8 }
  0x46   :  { %898 = vmatmul.mubr.msk.f32.gmra.mrb[28].mxu0 %vm71_vm0, %v49_v3 }
  0x47   :  { %274 = vmatprep.mubr.f32.mxu0 %v1274_v8 }
  0x4a   :  { %899 = vmatmul.mubr.msk.f32.gmra.mrb[30].mxu0 %vm71_vm0, %v50_v4 }
  0xe1   :  { %v186_v43 = vpop.f32.mrb[0].mxu0 }
  0xe2   :  { %v187_v44 = vadd.f32 %v186_v43, %v1583_v41  ;;  %v188_v45 = vpop.f32.mrb[1].mxu0 }
  0xe3   :  { %v189_v46 = vadd.f32 %v188_v45, %v1585_v42 }
  0xe4   :  { %v281_v49 = vmax.f32 %v187_v44, 0.0 }
  0xe5   :  { %v192_v47 = vpop.f32.mrb[2].mxu0  ;;  %v282_v48 = vmax.f32 %v189_v46, 0.0 }
  0xe6   :  { %v193_v50 = vadd.f32 %v192_v47, %v1583_v41  ;;  %v194_v51 = vpop.f32.mrb[3].mxu0 }
  0xe7   :  { %v195_v52 = vadd.f32 %v194_v51, %v1585_v42  ;;  %416 = vmatprep.mubr.f32.mxu1 %v282_v48 }
  0xe8   :  { %417 = vmatmul.mubr.f32.vlgmr.msra.gmra.mrb[0].mxu1 %v281_v49  ;;  %v283_v55 = vmax.f32 %v193_v50, 0.0 }
  0xe9   :  { %v284_v53 = vmax.f32 %v195_v52, 0.0  ;;  %v198_v54 = vpop.f32.mrb[4].mxu0 }
  0xea   :  { %v199_v56 = vadd.f32 %v198_v54, %v1583_v41  ;;  %v200_v57 = vpop.f32.mrb[5].mxu0 }
  0xeb   :  { %v201_v58 = vadd.f32 %v200_v57, %v1585_v42  ;;  %421 = vmatprep.mubr.f32.mxu1 %v284_v53 }
  0xec   :  { %422 = vmatmul.mubr.f32.gmra.mrb[2].mxu1 %v283_v55  ;;  %v285_v61 = vmax.f32 %v199_v56, 0.0 }
  0xed   :  { %v286_v59 = vmax.f32 %v201_v58, 0.0  ;;  %v204_v60 = vpop.f32.mrb[6].mxu0 }
  0xee   :  { %v205_v62 = vadd.f32 %v204_v60, %v1583_v41  ;;  %v206_v63 = vpop.f32.mrb[7].mxu0 }
  0xef   :  { %v207_v0 = vadd.f32 %v206_v63, %v1585_v42  ;;  %426 = vmatprep.mubr.f32.mxu1 %v286_v59 }
  0xf0   :  { %427 = vmatmul.mubr.f32.gmra.mrb[4].mxu1 %v285_v61  ;;  %v287_v3 = vmax.f32 %v205_v62, 0.0 }
  0xf1   :  { %v288_v1 = vmax.f32 %v207_v0, 0.0  ;;  %v210_v2 = vpop.f32.mrb[8].mxu0 }
  0xf2   :  { %v211_v4 = vadd.f32 %v210_v2, %v1583_v41  ;;  %v212_v5 = vpop.f32.mrb[9].mxu0 }
  0xf3   :  { %v213_v6 = vadd.f32 %v212_v5, %v1585_v42  ;;  %431 = vmatprep.mubr.f32.mxu1 %v288_v1 }
  0xf4   :  { %432 = vmatmul.mubr.f32.gmra.mrb[6].mxu1 %v287_v3  ;;  %v289_v10 = vmax.f32 %v211_v4, 0.0 }
  0xf5   :  { %v290_v7 = vmax.f32 %v213_v6, 0.0  ;;  %v216_v9 = vpop.f32.mrb[10].mxu0 }
  0xf6   :  { %v217_v11 = vadd.f32 %v216_v9, %v1583_v41  ;;  %v218_v12 = vpop.f32.mrb[11].mxu0 }
  0xf7   :  { %v219_v13 = vadd.f32 %v218_v12, %v1585_v42  ;;  %436 = vmatprep.mubr.f32.mxu1 %v290_v7 }
  0xf8   :  { %437 = vmatmul.mubr.f32.gmra.mrb[8].mxu1 %v289_v10  ;;  %v291_v16 = vmax.f32 %v217_v11, 0.0 }
  0xf9   :  { %v292_v14 = vmax.f32 %v219_v13, 0.0  ;;  %v222_v15 = vpop.f32.mrb[12].mxu0 }
  0xfa   :  { %v223_v17 = vadd.f32 %v222_v15, %v1583_v41  ;;  %v224_v18 = vpop.f32.mrb[13].mxu0 }
  0xfb   :  { %v225_v19 = vadd.f32 %v224_v18, %v1585_v42  ;;  %441 = vmatprep.mubr.f32.mxu1 %v292_v14  ;;  %v528_v18 = vld [vmem:[%s1742_s5 + $0x78] sm:$0xff] }
  0xfc   :  { %442 = vmatmul.mubr.f32.gmra.mrb[10].mxu1 %v291_v16  ;;  %v293_v22 = vmax.f32 %v223_v17, 0.0  ;;  %v527_v17 = vld [vmem:[%s1742_s5 + $0x70] sm:$0xff] }
  0xfd   :  { %v294_v20 = vmax.f32 %v225_v19, 0.0  ;;  %v228_v21 = vpop.f32.mrb[14].mxu0  ;;  %v1207_v19 = vpack.c.bf16 %v528_v18, %v527_v17 }
  0xfe   :  { %v229_v23 = vadd.f32 %v228_v21, %v1583_v41  ;;  %v230_v24 = vpop.f32.mrb[15].mxu0  ;;  %v700_v21 = vld [vmem:[%s1744_s7 + $0x18] sm:$0xff] }
  0xff   :  { %v231_v25 = vadd.f32 %v230_v24, %v1585_v42  ;;  %446 = vmatprep.mubr.f32.mxu1 %v294_v20  ;;  %1208 = vmatprep.subr.bf16.mxu0 %v1207_v19  ;;  %v699_v20 = vld [vmem:[%s1744_s7 + $0x10] sm:$0xff] }
 0x100   :  { %447 = vmatmul.mubr.f32.gmra.mrb[12].mxu1 %v293_v22  ;;  %v295_v28 = vmax.f32 %v229_v23, 0.0  ;;  %1210 = vmatpush3.bf16.msra.mxu0 %v1207_v19  ;;  %v701_v22 = vld [vmem:[%s1744_s7 + $0x20] sm:$0xff]  ;;  %v702_v23 = vld [vmem:[%s1744_s7 + $0x28] sm:$0xff]  ;;  %v703_v24 = vld [vmem:[%s1744_s7 + $0x30] sm:$0xff] }
 0x101   :  { %v296_v26 = vmax.f32 %v231_v25, 0.0  ;;  %v234_v27 = vpop.f32.mrb[16].mxu0  ;;  %v704_v25 = vld [vmem:[%s1744_s7 + $0x38] sm:$0xff] }
 0x102   :  { %v235_v29 = vadd.f32 %v234_v27, %v1583_v41  ;;  %v236_v30 = vpop.f32.mrb[17].mxu0  ;;  %v1652_v27 = vld [vmem:[%s1741_s4] ss:$0 sm:$0xff] }
 0x103   :  { %v237_v31 = vadd.f32 %v236_v30, %v1585_v42  ;;  %451 = vmatprep.mubr.f32.mxu1 %v296_v26 }
 0x104   :  { %452 = vmatmul.mubr.f32.gmra.mrb[14].mxu1 %v295_v28  ;;  %v297_v34 = vmax.f32 %v235_v29, 0.0 }
 0x105   :  { %v298_v32 = vmax.f32 %v237_v31, 0.0  ;;  %v240_v33 = vpop.f32.mrb[18].mxu0 }
 0x106   :  { %v241_v35 = vadd.f32 %v240_v33, %v1583_v41  ;;  %v242_v36 = vpop.f32.mrb[19].mxu0 }
 0x107   :  { %v243_v39 = vadd.f32 %v242_v36, %v1585_v42  ;;  %456 = vmatprep.mubr.f32.mxu1 %v298_v32 }
 0x108   :  { %457 = vmatmul.mubr.f32.gmra.mrb[16].mxu1 %v297_v34  ;;  %v299_v44 = vmax.f32 %v241_v35, 0.0 }
 0x109   :  { %v300_v40 = vmax.f32 %v243_v39, 0.0  ;;  %v246_v43 = vpop.f32.mrb[20].mxu0 }
 0x10a   :  { %v247_v45 = vadd.f32 %v246_v43, %v1583_v41  ;;  %v248_v46 = vpop.f32.mrb[21].mxu0 }
 0x10b   :  { %v249_v47 = vadd.f32 %v248_v46, %v1585_v42  ;;  %461 = vmatprep.mubr.f32.mxu1 %v300_v40 }
 0x10c   :  { %462 = vmatmul.mubr.f32.gmra.mrb[18].mxu1 %v299_v44  ;;  %v301_v50 = vmax.f32 %v247_v45, 0.0 }
 0x10d   :  { %v302_v48 = vmax.f32 %v249_v47, 0.0  ;;  %v252_v49 = vpop.f32.mrb[22].mxu0 }
 0x10e   :  { %v253_v51 = vadd.f32 %v252_v49, %v1583_v41  ;;  %v254_v52 = vpop.f32.mrb[23].mxu0 }
 0x10f   :  { %v255_v53 = vadd.f32 %v254_v52, %v1585_v42  ;;  %466 = vmatprep.mubr.f32.mxu1 %v302_v48 }
 0x110   :  { %467 = vmatmul.mubr.f32.gmra.mrb[20].mxu1 %v301_v50  ;;  %v303_v56 = vmax.f32 %v253_v51, 0.0 }
 0x111   :  { %v304_v54 = vmax.f32 %v255_v53, 0.0  ;;  %v258_v55 = vpop.f32.mrb[24].mxu0 }
 0x112   :  { %v259_v57 = vadd.f32 %v258_v55, %v1583_v41  ;;  %v260_v58 = vpop.f32.mrb[25].mxu0 }
 0x113   :  { %v261_v59 = vadd.f32 %v260_v58, %v1585_v42  ;;  %471 = vmatprep.mubr.f32.mxu1 %v304_v54 }
 0x114   :  { %472 = vmatmul.mubr.f32.gmra.mrb[22].mxu1 %v303_v56  ;;  %v305_v62 = vmax.f32 %v259_v57, 0.0 }
 0x115   :  { %v306_v60 = vmax.f32 %v261_v59, 0.0  ;;  %v264_v61 = vpop.f32.mrb[26].mxu0 }
 0x116   :  { %v265_v63 = vadd.f32 %v264_v61, %v1583_v41  ;;  %v266_v0 = vpop.f32.mrb[27].mxu0 }
 0x117   :  { %v267_v1 = vadd.f32 %v266_v0, %v1585_v42  ;;  %476 = vmatprep.mubr.f32.mxu1 %v306_v60 }
 0x118   :  { %477 = vmatmul.mubr.f32.gmra.mrb[24].mxu1 %v305_v62  ;;  %v307_v4 = vmax.f32 %v265_v63, 0.0 }
 0x119   :  { %v308_v2 = vmax.f32 %v267_v1, 0.0  ;;  %v270_v3 = vpop.f32.mrb[28].mxu0 }
 0x11a   :  { %v271_v5 = vadd.f32 %v270_v3, %v1583_v41  ;;  %v272_v6 = vpop.f32.mrb[29].mxu0 }
 0x11b   :  { %v273_v7 = vadd.f32 %v272_v6, %v1585_v42  ;;  %481 = vmatprep.mubr.f32.mxu1 %v308_v2 }
 0x11c   :  { %482 = vmatmul.mubr.f32.gmra.mrb[26].mxu1 %v307_v4  ;;  %v309_v11 = vmax.f32 %v271_v5, 0.0 }
 0x11d   :  { %v310_v9 = vmax.f32 %v273_v7, 0.0  ;;  %v276_v10 = vpop.f32.mrb[30].mxu0 }
 0x11e   :  { %v277_v12 = vadd.f32 %v276_v10, %v1583_v41  ;;  %v278_v13 = vpop.f32.mrb[31].mxu0  ;;  %v697_v41 = vld [vmem:[%s1744_s7] sm:$0xff] }
 0x11f   :  { %v279_v14 = vadd.f32 %v278_v13, %v1585_v42  ;;  %486 = vmatprep.mubr.f32.mxu1 %v310_v9  ;;  %715 = vxpose.xlu0.b32.start [1/8] (short) (narrow) %v697_v41, 8  ;;  %v698_v42 = vld [vmem:[%s1744_s7 + $0x8] sm:$0xff] }
 0x120   :  { %487 = vmatmul.mubr.f32.gmra.mrb[28].mxu1 %v309_v11  ;;  %v311_v16 = vmax.f32 %v277_v12, 0.0 }
 0x121   :  { %v312_v15 = vmax.f32 %v279_v14, 0.0 }
 0x123   :  { %491 = vmatprep.mubr.f32.mxu1 %v312_v15  ;;  %716 = vxpose.xlu0.b32.cont [2/8] (short) (narrow) %v698_v42, 8 }
 0x124   :  { %492 = vmatmul.mubr.f32.gmra.mrb[30].mxu1 %v311_v16 }
 0x125   :  { %1136 = vmatprep.mubr.msk.f32.mxu1 %vm1276_vm1, %v1274_v8 }
 0x127   :  { %717 = vxpose.xlu0.b32.cont [3/8] (short) (narrow) %v699_v20, 8 }
 0x12b   :  { %718 = vxpose.xlu0.b32.cont [4/8] (short) (narrow) %v700_v21, 8 }
 0x12f   :  { %719 = vxpose.xlu0.b32.cont [5/8] (short) (narrow) %v701_v22, 8 }
 0x133   :  { %720 = vxpose.xlu0.b32.cont [6/8] (short) (narrow) %v702_v23, 8 }
 0x137   :  { %721 = vxpose.xlu0.b32.cont [7/8] (short) (narrow) %v703_v24, 8 }
 0x13b   :  { %722 = vxpose.xlu0.b32.end [8/8] (short) (narrow) %v704_v25, 8 }
 0x1bb   :  { %v951_v26 = vpop.f32.mrb[0].mxu1 }
 0x1bc   :  { %v952_v28 = vpop.f32.mrb[1].mxu1 }
 0x1bd   :  { %v953_v29 = vadd.f32 %v952_v28, %v951_v26 }
 0x1bf   :  { %v419_v30 = vadd.f32 %v953_v29, %v1652_v27  ;;  %v954_v31 = vpop.f32.mrb[2].mxu1 }
 0x1c0   :  { %v955_v32 = vpop.f32.mrb[3].mxu1 }
 0x1c1   :  { %v497_v33 = vmax.f32 %v419_v30, 0.0  ;;  %v956_v34 = vadd.f32 %v955_v32, %v954_v31 }
 0x1c3   :  { %v424_v35 = vadd.f32 %v956_v34, %v1652_v27  ;;  %v957_v36 = vpop.f32.mrb[4].mxu1  ;;  %1080 = vmatprep.mubr.f32.mxu0 %v497_v33 }
 0x1c4   :  { %v958_v39 = vpop.f32.mrb[5].mxu1 }
 0x1c5   :  { %v498_v40 = vmax.f32 %v424_v35, 0.0  ;;  %v959_v43 = vadd.f32 %v958_v39, %v957_v36 }
 0x1c7   :  { %v429_v44 = vadd.f32 %v959_v43, %v1652_v27  ;;  %v960_v45 = vpop.f32.mrb[6].mxu1  ;;  %1081 = vmatmul.mubr.f32.vlgmr.msra.gmra.mrb[32].mxu0 %v498_v40 }
 0x1c8   :  { %v961_v46 = vpop.f32.mrb[7].mxu1 }
 0x1c9   :  { %v499_v47 = vmax.f32 %v429_v44, 0.0  ;;  %v962_v48 = vadd.f32 %v961_v46, %v960_v45 }
 0x1cb   :  { %v434_v49 = vadd.f32 %v962_v48, %v1652_v27  ;;  %v963_v50 = vpop.f32.mrb[8].mxu1  ;;  %1083 = vmatprep.mubr.f32.mxu0 %v499_v47 }
 0x1cc   :  { %v964_v51 = vpop.f32.mrb[9].mxu1 }
 0x1cd   :  { %v500_v52 = vmax.f32 %v434_v49, 0.0  ;;  %v965_v53 = vadd.f32 %v964_v51, %v963_v50  ;;  %v1275_v51 = vmov 0.0|0.0  }
 0x1ce   :  { %1211 = vmatprep.subr.bf16.mxu1 %v1275_v51 }
 0x1cf   :  { %v439_v54 = vadd.f32 %v965_v53, %v1652_v27  ;;  %v966_v55 = vpop.f32.mrb[10].mxu1  ;;  %1084 = vmatmul.mubr.f32.gmra.mrb[34].mxu0 %v500_v52  ;;  %v705_v52 = vld [vmem:[#allocation2] sm:$0x1]  ;;  %v1277_v53 = vmov 0  }
 0x1d0   :  { %v967_v56 = vpop.f32.mrb[11].mxu1  ;;  %1248 = vset.pattern.permute.xlu1 %v1277_v53  ;;  %1249 = vset.pattern.permute.xlu0 %v1277_v53 }
 0x1d1   :  { %v501_v57 = vmax.f32 %v439_v54, 0.0  ;;  %v968_v58 = vadd.f32 %v967_v56, %v966_v55  ;;  %708 = vperm.xlu1 %1248, %v705_v52   ;;  %v1675_v54 = vld [vmem:[%s1743_s6] ss:$0 sm:$0xff]  ;;  %s1278_s6 = smov [#allocation3]  }
 0x1d2   :  { %s876_s29 = sshll.u32 %s1278_s6, 4  ;;  %s877_s29 = int_to_ptr.vmem [resolvable:$true] %s876_s29 }
 0x1d3   :  { %v444_v59 = vadd.f32 %v968_v58, %v1652_v27  ;;  %v969_v60 = vpop.f32.mrb[12].mxu1  ;;  %1086 = vmatprep.mubr.f32.mxu0 %v501_v57  ;;  %s1250_s30 = scalar_lea.vmem %s877_s29, 16  ;;  %s1254_s10 = scalar_lea.vmem %s877_s29, 32 }
 0x1d4   :  { %v970_v61 = vpop.f32.mrb[13].mxu1  ;;  %p1251_p0 = scmp.ne.s32.totalorder %s877_s29, %s1250_s30  ;;  %p1255_p1 = scmp.lt.s32.totalorder %s877_s29, %s877_s29 }
 0x1d5   :  { %v502_v62 = vmax.f32 %v444_v59, 0.0  ;;  %v971_v63 = vadd.f32 %v970_v61, %v969_v60  ;;  %p1256_p2 = scmp.lt.s32.totalorder %s1254_s10, %s1250_s30 }
 0x1d7   :  { %v449_v0 = vadd.f32 %v971_v63, %v1652_v27  ;;  %v972_v1 = vpop.f32.mrb[14].mxu1  ;;  %1087 = vmatmul.mubr.f32.gmra.mrb[36].mxu0 %v502_v62  ;;  %p1257_p3 = por %p1256_p2, %p1255_p1 }
 0x1d8   :  { %v973_v2 = vpop.f32.mrb[15].mxu1 }
 0x1d9   :  { %v503_v3 = vmax.f32 %v449_v0, 0.0  ;;  %v974_v4 = vadd.f32 %v973_v2, %v972_v1  ;;  %p1258_p4 = pnand %p1257_p3, %p1251_p0 }
 0x1db   :  { %v454_v5 = vadd.f32 %v974_v4, %v1652_v27  ;;  %v975_v6 = vpop.f32.mrb[16].mxu1  ;;  %1089 = vmatprep.mubr.f32.mxu0 %v503_v3 }
 0x1dc   :  { %v976_v7 = vpop.f32.mrb[17].mxu1 }
 0x1dd   :  { %v504_v9 = vmax.f32 %v454_v5, 0.0  ;;  %v977_v10 = vadd.f32 %v976_v7, %v975_v6 }
 0x1df   :  { %v459_v11 = vadd.f32 %v977_v10, %v1652_v27  ;;  %v978_v12 = vpop.f32.mrb[18].mxu1  ;;  %1090 = vmatmul.mubr.f32.gmra.mrb[38].mxu0 %v504_v9 }
 0x1e0   :  { %v979_v13 = vpop.f32.mrb[19].mxu1 }
 0x1e1   :  { %v505_v14 = vmax.f32 %v459_v11, 0.0  ;;  %v980_v15 = vadd.f32 %v979_v13, %v978_v12 }
 0x1e3   :  { %v464_v16 = vadd.f32 %v980_v15, %v1652_v27  ;;  %v981_v17 = vpop.f32.mrb[20].mxu1  ;;  %1092 = vmatprep.mubr.f32.mxu0 %v505_v14 }
 0x1e4   :  { %v982_v18 = vpop.f32.mrb[21].mxu1 }
 0x1e5   :  { %v506_v19 = vmax.f32 %v464_v16, 0.0  ;;  %v983_v41 = vadd.f32 %v982_v18, %v981_v17 }
 0x1e7   :  { %v469_v42 = vadd.f32 %v983_v41, %v1652_v27  ;;  %v984_v20 = vpop.f32.mrb[22].mxu1  ;;  %1093 = vmatmul.mubr.f32.gmra.mrb[40].mxu0 %v506_v19 }
 0x1e8   :  { %v985_v21 = vpop.f32.mrb[23].mxu1 }
 0x1e9   :  { %v507_v22 = vmax.f32 %v469_v42, 0.0  ;;  %v986_v23 = vadd.f32 %v985_v21, %v984_v20 }
 0x1eb   :  { %v474_v24 = vadd.f32 %v986_v23, %v1652_v27  ;;  %v987_v25 = vpop.f32.mrb[24].mxu1  ;;  %1095 = vmatprep.mubr.f32.mxu0 %v507_v22 }
 0x1ec   :  { %v988_v26 = vpop.f32.mrb[25].mxu1 }
 0x1ed   :  { %v508_v28 = vmax.f32 %v474_v24, 0.0  ;;  %v989_v29 = vadd.f32 %v988_v26, %v987_v25 }
 0x1ef   :  { %v479_v30 = vadd.f32 %v989_v29, %v1652_v27  ;;  %v990_v31 = vpop.f32.mrb[26].mxu1  ;;  %1096 = vmatmul.mubr.f32.gmra.mrb[42].mxu0 %v508_v28 }
 0x1f0   :  { %v991_v32 = vpop.f32.mrb[27].mxu1 }
 0x1f1   :  { %v509_v33 = vmax.f32 %v479_v30, 0.0  ;;  %v992_v34 = vadd.f32 %v991_v32, %v990_v31 }
 0x1f3   :  { %v484_v35 = vadd.f32 %v992_v34, %v1652_v27  ;;  %v993_v36 = vpop.f32.mrb[28].mxu1  ;;  %1098 = vmatprep.mubr.f32.mxu0 %v509_v33 }
 0x1f4   :  { %v994_v39 = vpop.f32.mrb[29].mxu1 }
 0x1f5   :  { %v510_v40 = vmax.f32 %v484_v35, 0.0  ;;  %v995_v43 = vadd.f32 %v994_v39, %v993_v36 }
 0x1f7   :  { %v489_v44 = vadd.f32 %v995_v43, %v1652_v27  ;;  %v996_v45 = vpop.f32.mrb[30].mxu1  ;;  %1099 = vmatmul.mubr.f32.gmra.mrb[44].mxu0 %v510_v40 }
 0x1f8   :  { %v997_v46 = vpop.f32.mrb[31].mxu1 }
 0x1f9   :  { %v511_v47 = vmax.f32 %v489_v44, 0.0  ;;  %v998_v48 = vadd.f32 %v997_v46, %v996_v45 }
 0x1fb   :  { %v494_v49 = vadd.f32 %v998_v48, %v1652_v27  ;;  %1101 = vmatprep.mubr.f32.mxu0 %v511_v47 }
 0x1fd   :  { %v512_v50 = vmax.f32 %v494_v49, 0.0 }
 0x1ff   :  { %1102 = vmatmul.mubr.f32.gmra.mrb[46].mxu0 %v512_v50  ;;  %v731_v50 = vpop.trf.xlu0 }
 0x250   :  { %v709_v52 = vpop.permute.xlu1 %708 }
 0x251   :  { %v714_v53 = vrot.slane %v709_v52, %v63_v38 }
 0x29a   :  { %v1082_v27 = vpop.f32.mrb[32].mxu0 }
 0x29b   :  { %v608_v55 = vadd.f32 %v1082_v27, %v1675_v54  ;;  %v602_v56 = vpop.f32.mrb[33].mxu0 }
 0x29c   :  { %v603_v57 = vadd.f32 %v1675_v54, %v602_v56 }
 0x29d   :  { %v682_v58 = vmax.f32 %v608_v55, 0.0 }
 0x29e   :  { %v681_v59 = vmax.f32 %v603_v57, 0.0 }
 0x2a0   :  { %v1212_v60 = vpack.c.bf16 %v682_v58, %v681_v59 }
 0x2a2   :  { %v1085_v61 = vpop.f32.mrb[34].mxu0  ;;  %1214 = vmatpush3.bf16.xpose.msk.msra.mxu1 %vm1681_vm3, %v1212_v60 }
 0x2a3   :  { %v618_v62 = vadd.f32 %v1085_v61, %v1675_v54  ;;  %v612_v63 = vpop.f32.mrb[35].mxu0  ;;  %1215 = vmatprep.subr.bf16.mxu1 %v1275_v51 }
 0x2a4   :  { %v613_v0 = vadd.f32 %v1675_v54, %v612_v63 }
 0x2a5   :  { %v684_v1 = vmax.f32 %v618_v62, 0.0 }
 0x2a6   :  { %v683_v2 = vmax.f32 %v613_v0, 0.0 }
 0x2a8   :  { %v1216_v3 = vpack.c.bf16 %v684_v1, %v683_v2 }
 0x2aa   :  { %v1088_v4 = vpop.f32.mrb[36].mxu0  ;;  %1218 = vmatpush3.bf16.xpose.msk.msra.mxu1 %vm1681_vm3, %v1216_v3 }
 0x2ab   :  { %v628_v5 = vadd.f32 %v1088_v4, %v1675_v54  ;;  %v622_v6 = vpop.f32.mrb[37].mxu0  ;;  %1219 = vmatprep.subr.bf16.mxu1 %v1275_v51 }
 0x2ac   :  { %v623_v7 = vadd.f32 %v1675_v54, %v622_v6 }
 0x2ad   :  { %v686_v9 = vmax.f32 %v628_v5, 0.0 }
 0x2ae   :  { %v685_v10 = vmax.f32 %v623_v7, 0.0 }
 0x2b0   :  { %v1220_v11 = vpack.c.bf16 %v686_v9, %v685_v10 }
 0x2b2   :  { %v1091_v12 = vpop.f32.mrb[38].mxu0  ;;  %1222 = vmatpush3.bf16.xpose.msk.msra.mxu1 %vm1681_vm3, %v1220_v11 }
 0x2b3   :  { %v638_v13 = vadd.f32 %v1091_v12, %v1675_v54  ;;  %v632_v14 = vpop.f32.mrb[39].mxu0  ;;  %1223 = vmatprep.subr.bf16.mxu1 %v1275_v51 }
 0x2b4   :  { %v633_v15 = vadd.f32 %v1675_v54, %v632_v14 }
 0x2b5   :  { %v688_v16 = vmax.f32 %v638_v13, 0.0 }
 0x2b6   :  { %v687_v17 = vmax.f32 %v633_v15, 0.0 }
 0x2b8   :  { %v1224_v18 = vpack.c.bf16 %v688_v16, %v687_v17 }
 0x2ba   :  { %v1094_v19 = vpop.f32.mrb[40].mxu0  ;;  %1226 = vmatpush3.bf16.xpose.msk.msra.mxu1 %vm1681_vm3, %v1224_v18 }
 0x2bb   :  { %v648_v41 = vadd.f32 %v1094_v19, %v1675_v54  ;;  %v642_v42 = vpop.f32.mrb[41].mxu0  ;;  %1227 = vmatprep.subr.bf16.mxu1 %v1275_v51 }
 0x2bc   :  { %v643_v20 = vadd.f32 %v1675_v54, %v642_v42 }
 0x2bd   :  { %v690_v21 = vmax.f32 %v648_v41, 0.0 }
 0x2be   :  { %v689_v22 = vmax.f32 %v643_v20, 0.0 }
 0x2c0   :  { %v1228_v23 = vpack.c.bf16 %v690_v21, %v689_v22 }
 0x2c2   :  { %v1097_v24 = vpop.f32.mrb[42].mxu0  ;;  %1230 = vmatpush3.bf16.xpose.msk.msra.mxu1 %vm1681_vm3, %v1228_v23 }
 0x2c3   :  { %v658_v25 = vadd.f32 %v1097_v24, %v1675_v54  ;;  %v652_v26 = vpop.f32.mrb[43].mxu0  ;;  %1231 = vmatprep.subr.bf16.mxu1 %v1275_v51 }
 0x2c4   :  { %v653_v28 = vadd.f32 %v1675_v54, %v652_v26 }
 0x2c5   :  { %v692_v29 = vmax.f32 %v658_v25, 0.0 }
 0x2c6   :  { %v691_v30 = vmax.f32 %v653_v28, 0.0 }
 0x2c8   :  { %v1232_v31 = vpack.c.bf16 %v692_v29, %v691_v30 }
 0x2ca   :  { %v1100_v32 = vpop.f32.mrb[44].mxu0  ;;  %1234 = vmatpush3.bf16.xpose.msk.msra.mxu1 %vm1681_vm3, %v1232_v31 }
 0x2cb   :  { %v668_v33 = vadd.f32 %v1100_v32, %v1675_v54  ;;  %v662_v34 = vpop.f32.mrb[45].mxu0  ;;  %1235 = vmatprep.subr.bf16.mxu1 %v1275_v51 }
 0x2cc   :  { %v663_v35 = vadd.f32 %v1675_v54, %v662_v34 }
 0x2cd   :  { %v694_v36 = vmax.f32 %v668_v33, 0.0 }
 0x2ce   :  { %v693_v39 = vmax.f32 %v663_v35, 0.0 }
 0x2d0   :  { %v1236_v40 = vpack.c.bf16 %v694_v36, %v693_v39 }
 0x2d2   :  { %v1103_v43 = vpop.f32.mrb[46].mxu0  ;;  %1238 = vmatpush3.bf16.xpose.msk.msra.mxu1 %vm1681_vm3, %v1236_v40 }
 0x2d3   :  { %v678_v44 = vadd.f32 %v1103_v43, %v1675_v54  ;;  %v672_v45 = vpop.f32.mrb[47].mxu0  ;;  %1239 = vmatprep.subr.bf16.mxu1 %v1275_v51 }
 0x2d4   :  { %v673_v46 = vadd.f32 %v1675_v54, %v672_v45 }
 0x2d5   :  { %v696_v47 = vmax.f32 %v678_v44, 0.0 }
 0x2d6   :  { %v695_v48 = vmax.f32 %v673_v46, 0.0 }
 0x2d8   :  { %v1240_v49 = vpack.c.bf16 %v696_v47, %v695_v48 }
 0x2da   :  { %1242 = vmatpush3.bf16.xpose.msk.msra.mxu1 %vm1681_vm3, %v1240_v49 }
 0x2e1   :  { %1137 = vmatmul.mubr.msk.f32.vlgmr.msra.gmra.mrb[32].mxu1 %vm747_vm2, %v731_v50 }
 0x3b4   :  { %v865_v27 = vpop.f32.mrb[32].mxu1 }
 0x3b5   :  { %v866_v55 = vadd.f32 %v865_v27, %v714_v53  ;;  %v1138_v51 = vpop.f32.mrb[33].mxu1 }
 0x3b7   :  { %869 = vst [vmem:[#allocation3] sm:$0x1] %v866_v55 }
 0x3b8   :  { %1261 = shalt.err (!%p1258_p4)
}
 0x3b9   :  { %s1262_s2 = scalar_lea.hbm %s1746_s9, 16 }
 0x3ba   :  { %p1263_p5 = scmp.ne.s32.totalorder %s1746_s9, %s1262_s2  ;;  %p1266_p6 = scmp.lt.u32.totalorder %s1262_s2, %s1746_s9 }
 0x3bc   :  { %p1268_p7 = pnand %p1266_p6, %p1263_p5 }
 0x3be   :  { %1271 = shalt.err (!%p1268_p7)
}
 0x3bf   :  { %879 = dma.vmem_to_hbm [thread:$0]  %s877_s29, 16, %s1746_s9, [#allocation4]  }
 0x3c0   :  { %1272 = dma.done.wait [#allocation4], 16  }
 0x3c1   :  { %1273 = vsyncadd [#allocation4], 4294967280 }
 0x3c2   :  { %883 = vsyncpa [#allocation4], 1 }

</bundles_post_ra>
